<compile_context>
chip_gen: v6e
topology: v6e:2x2x1
jax: 0.10.0
libtpu: 0.0.40
codegen_flags: <defaults>
</compile_context>

<pallas_src>
import functools

import jax
import jax.numpy as jnp
from jax.experimental import pallas as pl
from jax.experimental.pallas import tpu as pltpu


# ----------------------------- Pallas kernel ------------------------------ #
def _rope_kernel(freq_ref, phase_ref, x_ref, o_ref, *, seq_tile):
    # freq_ref:  (1, E) f32   inv_freq tiled twice (sin half | cos half)
    # phase_ref: (1, E) f32   0 for the sin half, pi/2 for the cos half
    # x_ref:     (bt, ts, E)  input tile
    # o_ref:     (bt, ts, E)  output tile
    ts, E = x_ref.shape[1], x_ref.shape[2]

    # Absolute sequence position of each row of this tile (regenerated from
    # iota — no (S, E) positional-encoding tensor ever touches HBM).
    s0 = pl.program_id(1) * seq_tile
    pos = (jax.lax.broadcasted_iota(jnp.int32, (ts, E), 0) + s0).astype(jnp.float32)

    # One EUP transcendental per element: sin(pos*f + phase) covers both the
    # sin half (phase=0) and the cos half (phase=pi/2).
    enc = jnp.sin(pos * freq_ref[...] + phase_ref[...])            # (ts, E)

    x = x_ref[...].astype(jnp.float32)                             # (bt, ts, E)
    o_ref[...] = (x * enc[None, :, :]).astype(o_ref.dtype)


# ----------------------------- tiling helpers ------------------------------ #
_TARGET_BLOCK_ELEMS = 256 * 1024   # ~1 MiB f32 per buffer -> <<32 MiB w/ dbl-buf


def _pick_seq_tile(S, cap):
    # Full-S blocks are always legal; otherwise the 2nd-minor block dim must be
    # a multiple of 8 (sublane constraint) and divide S.
    if S <= cap:
        return S
    for t in range(min(S, cap), 7, -1):
        if S % t == 0 and t % 8 == 0:
            return t
    return S


def _pick_batch_tile(B, cap):
    for t in range(min(B, cap), 0, -1):
        if B % t == 0:
            return t
    return 1


# ------------------------------ host wrapper ------------------------------- #
def rope_forward(x, freq, phase):
    B, S, E = x.shape
    ts = _pick_seq_tile(S, max(8, _TARGET_BLOCK_ELEMS // max(E, 1)))
    bt = _pick_batch_tile(B, max(1, _TARGET_BLOCK_ELEMS // max(ts * E, 1)))
    grid = (B // bt, S // ts)

    kernel = functools.partial(_rope_kernel, seq_tile=ts)
    grid_spec = pltpu.PrefetchScalarGridSpec(
        num_scalar_prefetch=0,
        grid=grid,
        in_specs=[
            pl.BlockSpec((1, E), lambda b, s: (0, 0)),      # freq  (tiny, resident)
            pl.BlockSpec((1, E), lambda b, s: (0, 0)),      # phase (tiny, resident)
            pl.BlockSpec((bt, ts, E), lambda b, s: (b, s, 0)),
        ],
        out_specs=pl.BlockSpec((bt, ts, E), lambda b, s: (b, s, 0)),
    )
    return pl.pallas_call(
        kernel,
        out_shape=jax.ShapeDtypeStruct((B, S, E), x.dtype),
        grid_spec=grid_spec,
        compiler_params=pltpu.CompilerParams(
            dimension_semantics=("parallel", "parallel"),
            vmem_limit_bytes=32 * 1024 * 1024,
        ),
    )(freq, phase, x)


class RoPE:
    """JAX/Pallas port of the PyTorch RoPE module's forward pass."""

    def __init__(self, embed_size):
        assert embed_size % 2 == 0, "embed_size must be even"
        self.embed_size = embed_size
        half = embed_size // 2
        inv_freq = 1.0 / (10000.0 ** (
            jnp.arange(0, embed_size, 2, dtype=jnp.float32) / embed_size))
        # Full-width frequency row (sin half | cos half) and the phase row that
        # turns the cos half into sin(a + pi/2).
        self.freq = jnp.concatenate([inv_freq, inv_freq]).reshape(1, embed_size)
        self.phase = jnp.concatenate(
            [jnp.zeros((half,), jnp.float32),
             jnp.full((half,), jnp.pi / 2, jnp.float32)]).reshape(1, embed_size)

    def __call__(self, x):
        return rope_forward(x, self.freq, self.phase)


# ------------------------------- reference --------------------------------- #
def rope_reference(x, embed_size):
    S = x.shape[1]
    inv_freq = 1.0 / (10000.0 ** (
        jnp.arange(0, embed_size, 2, dtype=jnp.float32) / embed_size))
    pos = jnp.arange(S, dtype=jnp.float32)[:, None]
    sinusoid = pos * inv_freq[None, :]
    pos_enc = jnp.concatenate([jnp.sin(sinusoid), jnp.cos(sinusoid)], axis=-1)
    return x * pos_enc[None, :, :]


# --------------------------------- main ------------------------------------ #
if __name__ == "__main__":
    B, S, E = 2, 8, 32
    key = jax.random.PRNGKey(0)
    x = jax.random.normal(key, (B, S, E), dtype=jnp.float32)

    rope = RoPE(embed_size=E)
    out = jax.block_until_ready(rope(x))

    ref = rope_reference(x, E)
    assert out.shape == (B, S, E)
    assert jnp.all(jnp.isfinite(out))
    assert jnp.allclose(out, ref, rtol=1e-5, atol=1e-5)
    print("KERNEL_OK")
</pallas_src>

<mosaic_0001>
module attributes {stable_mosaic.version = 11 : i64} {
  func.func @_rope_kernel(%arg0: i32, %arg1: i32, %arg2: memref<1x32xf32, #tpu.memory_space<vmem>>, %arg3: memref<1x32xf32, #tpu.memory_space<vmem>>, %arg4: memref<2x8x32xf32, #tpu.memory_space<vmem>>, %arg5: memref<2x8x32xf32, #tpu.memory_space<vmem>>) attributes {dimension_semantics = [#tpu.dimension_semantics<parallel>, #tpu.dimension_semantics<parallel>], iteration_bounds = array<i64: 1, 1>, scalar_prefetch = 0 : i64, scratch_operands = 0 : i64, tpu.core_type = #tpu.core_type<tc>, window_params = [{pipeline_mode = #tpu.pipeline_mode<synchronous>, transform_indices = @transform_0, window_bounds = array<i64: 1, 32>}, {pipeline_mode = #tpu.pipeline_mode<synchronous>, transform_indices = @transform_1, window_bounds = array<i64: 1, 32>}, {transform_indices = @transform_2, window_bounds = array<i64: 2, 8, 32>}, {transform_indices = @transform_3, window_bounds = array<i64: 2, 8, 32>}]} {
    %c8_i32 = arith.constant 8 : i32
    %0 = arith.muli %arg1, %c8_i32 : i32
    %1 = tpu.iota {dimensions = array<i32: 0>} : vector<8x32xi32>
    %2 = vector.broadcast %0 : i32 to vector<8x32xi32>
    %3 = arith.addi %1, %2 : vector<8x32xi32>
    %4 = arith.sitofp %3 : vector<8x32xi32> to vector<8x32xf32>
    %c0 = arith.constant 0 : index
    %c0_0 = arith.constant 0 : index
    %5 = vector.load %arg2[%c0, %c0_0] : memref<1x32xf32, #tpu.memory_space<vmem>>, vector<1x32xf32>
    %6 = vector.broadcast %5 : vector<1x32xf32> to vector<8x32xf32>
    %7 = arith.mulf %4, %6 : vector<8x32xf32>
    %c0_1 = arith.constant 0 : index
    %c0_2 = arith.constant 0 : index
    %8 = vector.load %arg3[%c0_1, %c0_2] : memref<1x32xf32, #tpu.memory_space<vmem>>, vector<1x32xf32>
    %9 = vector.broadcast %8 : vector<1x32xf32> to vector<8x32xf32>
    %10 = arith.addf %7, %9 : vector<8x32xf32>
    %11 = math.sin %10 : vector<8x32xf32>
    %c0_3 = arith.constant 0 : index
    %c0_4 = arith.constant 0 : index
    %c0_5 = arith.constant 0 : index
    %12 = vector.load %arg4[%c0_3, %c0_4, %c0_5] : memref<2x8x32xf32, #tpu.memory_space<vmem>>, vector<2x8x32xf32>
    %13 = vector.shape_cast %11 : vector<8x32xf32> to vector<1x8x32xf32>
    %14 = vector.broadcast %13 : vector<1x8x32xf32> to vector<2x8x32xf32>
    %15 = arith.mulf %12, %14 : vector<2x8x32xf32>
    %c0_6 = arith.constant 0 : index
    %c0_7 = arith.constant 0 : index
    %c0_8 = arith.constant 0 : index
    %16 = vector.load %arg5[%c0_6, %c0_7, %c0_8] : memref<2x8x32xf32, #tpu.memory_space<vmem>>, vector<2x8x32xf32>
    tpu.vector_store %arg5[%c0_6, %c0_7, %c0_8], %15 {strides = array<i32>} : memref<2x8x32xf32, #tpu.memory_space<vmem>>, vector<2x8x32xf32>,
    return
  }
  func.func @transform_0(%arg0: i32, %arg1: i32) -> (i32, i32) {
    %c0_i32 = arith.constant 0 : i32
    %c0_i32_0 = arith.constant 0 : i32
    %c0_i32_1 = arith.constant 0 : i32
    return %c0_i32, %c0_i32_0 : i32, i32
  }
  func.func @transform_1(%arg0: i32, %arg1: i32) -> (i32, i32) {
    %c0_i32 = arith.constant 0 : i32
    %c0_i32_0 = arith.constant 0 : i32
    %c0_i32_1 = arith.constant 0 : i32
    return %c0_i32, %c0_i32_0 : i32, i32
  }
  func.func @transform_2(%arg0: i32, %arg1: i32) -> (i32, i32, i32) {
    %c0_i32 = arith.constant 0 : i32
    %c0_i32_0 = arith.constant 0 : i32
    return %arg0, %arg1, %c0_i32 : i32, i32, i32
  }
  func.func @transform_3(%arg0: i32, %arg1: i32) -> (i32, i32, i32) {
    %c0_i32 = arith.constant 0 : i32
    %c0_i32_0 = arith.constant 0 : i32
    return %arg0, %arg1, %c0_i32 : i32, i32, i32
  }
}

</mosaic_0001>

<bundles_post_ra>
// kernel: tpu_custom_call.1
= control target key start
LH: loop header
LB: loop body
LE: loop exit
PB: predicated region body
PF: predicated region fallthrough
CT: control target
= control target key end

     0   :  { %8 = vsyncpa [#allocation3], 0  ;;  %s353_s0 = inlined_call_operand.hbm [shape: f32[1,32], index: 0, kind: input, shape index: {}]   ;;  %s354_s1 = inlined_call_operand.vmem [shape: f32[1,32], index: 1, kind: input, shape index: {}]   ;;  %s355_s2 = inlined_call_operand.hbm [shape: f32[2,8,32], index: 2, kind: input, shape index: {}]   ;;  %s356_s3 = inlined_call_operand.hbm [shape: f32[2,8,32], index: 3, kind: output, shape index: {}]  }
   0x1   :  { %9 = vsyncpa [#allocation6], 0 }
   0x2   :  { %10 = vsyncpa [#allocation4], 0  ;;  %s283_s12 = smov [#allocation2]   ;;  %s284_s14 = smov [#allocation5]  }
   0x3   :  { %s17_s13 = sshll.u32 %s283_s12, 4  ;;  %s28_s15 = sshll.u32 %s284_s14, 4  ;;  %s18_s13 = int_to_ptr.vmem [resolvable:$true] %s17_s13  ;;  %s29_s15 = int_to_ptr.vmem [resolvable:$true] %s28_s15 }
   0x4   :  { %s225_s16 = scalar_lea.vmem %s18_s13, 16  ;;  %s229_s17 = scalar_lea.vmem %s18_s13, 32 }
   0x5   :  { %p226_p0 = scmp.ne.s32.totalorder %s18_s13, %s225_s16  ;;  %p230_p1 = scmp.lt.s32.totalorder %s18_s13, %s18_s13 }
   0x6   :  { %p231_p2 = scmp.lt.s32.totalorder %s229_s17, %s225_s16 }
   0x8   :  { %p232_p3 = por %p231_p2, %p230_p1 }
   0xa   :  { %p233_p4 = pnand %p232_p3, %p226_p0 }
   0xc   :  { %236 = shalt.err (!%p233_p4)
}
   0xd   :  { %20 = dma.hbm_to_vmem [thread:$0]  %s353_s0, 16, %s18_s13, [#allocation3]  }
   0xe   :  { %s245_s20 = scalar_lea.vmem %s29_s15, 256  ;;  %p250_p6 = scmp.lt.s32.totalorder %s29_s15, %s29_s15 }
   0xf   :  { %p246_p5 = scmp.ne.s32.totalorder %s29_s15, %s245_s20  ;;  %p251_p7 = scmp.lt.s32.totalorder %s245_s20, %s245_s20 }
  0x11   :  { %p252_p8 = por %p251_p7, %p250_p6 }
  0x13   :  { %p253_p9 = pnand %p252_p8, %p246_p5 }
  0x15   :  { %256 = shalt.err (!%p253_p9)
}
  0x16   :  { %s285_s21 = smov 128   ;;  %s286_s22 = smov 8  }
  0x17   :  { %34 = dma.hbm_to_vmem [thread:$0]  %s355_s2, 256, %s29_s15, [#allocation6], %s285_s21, %s285_s21, %s286_s22  }
  0x18   :  { %277 = dma.done.wait [#allocation3], 16  }
  0x19   :  { %278 = vsyncadd [#allocation3], 4294967280 }
  0x1a   :  { %279 = dma.done.wait [#allocation6], 256  }
  0x1b   :  { %280 = vsyncadd [#allocation6], 4294967040  ;;  %v42_v0 = vlaneseq  ;;  %v192_v3 = vld [vmem:[#allocation2] ss:$0 sm:$0xff]  ;;  %v287_v18 = vmov 683565275  }
  0x1c   :  { %v193_v4 = vld [vmem:[%s354_s1] ss:$0 sm:$0xff]  ;;  %v288_v20 = vmov 2475754826   ;;  %v289_v22 = vmov 2131351028  }
  0x1d   :  { %v43_v1 = vshrl.u32 %v42_v0, 7  ;;  %v290_v24 = vmov 2102212464   ;;  %v291_v26 = vmov 920167782   ;;  %s293_s1 = smov [#allocation7]  }
  0x1e   :  { %v292_v33 = vmov 1326507024   ;;  %s179_s2 = sshll.u32 %s293_s1, 4  ;;  %vm171_vm13 = vcmask 261120   ;;  %s180_s2 = int_to_ptr.vmem [resolvable:$true] %s179_s2 }
  0x1f   :  { %v46_v2 = vcvt.s32.f32 %v43_v1  ;;  %s257_s26 = scalar_lea.vmem %s180_s2, 256  ;;  %p262_p11 = scmp.lt.s32.totalorder %s180_s2, %s180_s2 }
  0x20   :  { %p258_p10 = scmp.ne.s32.totalorder %s180_s2, %s257_s26  ;;  %p263_p12 = scmp.lt.s32.totalorder %s257_s26, %s257_s26 }
  0x21   :  { %v54_v5 = vmul.f32 %v192_v3, %v46_v2 }
  0x22   :  { %p264_p13 = por %p263_p12, %p262_p11 }
  0x23   :  { %v326_v6 = vadd.f32 %v193_v4, %v54_v5 }
  0x24   :  { %p265_p0 = pnand %p264_p13, %p258_p10 }
  0x25   :  { %v66_v7 = vand.u32 2139095040, %v326_v6  ;;  %v63_v9 = vand.u32 2147483647, %v326_v6  ;;  %vm65_vm7 = vcmp.lt.s32.totalorder %v326_v6, 0  ;;  %vm155_vm12 = vweird.f32 %v326_v6 }
  0x27   :  { %v67_v8 = vshrl.u32 %v66_v7, 23  ;;  %v70_v12 = vand.u32 8388607, %v63_v9  ;;  %vm64_vm8 = vcmp.le.f32.partialorder %v63_v9, 0.7853982 }
  0x29   :  { %v194_v10 = vadd.s32 4294967169, %v67_v8  ;;  %v71_v15 = vor.u32 8388608, %v70_v12 }
  0x2b   :  { %v73_v11 = vadd.s32 1, %v194_v10  ;;  %v111_v35 = vshll.u32 %v71_v15, 8 }
  0x2d   :  { %vm74_vm0 = vcmp.gt.s32.totalorder %v73_v11, 0 }
  0x2e   :  { %v75_v13 = vsel %vm74_vm0, %v73_v11, 0 }
  0x2f   :  { %v77_v14 = vand.u32 31, %v75_v13  ;;  %v76_v16 = vshrl.u32 %v75_v13, 5 }
  0x31   :  { %v78_v17 = vsub.s32 32, %v77_v14  ;;  %v80_v19 = vshll.u32 %v287_v18, %v77_v14  ;;  %v83_v21 = vshll.u32 %v288_v20, %v77_v14  ;;  %v86_v23 = vshll.u32 %v289_v22, %v77_v14 }
  0x32   :  { %v89_v25 = vshll.u32 %v290_v24, %v77_v14  ;;  %v92_v27 = vshll.u32 %v291_v26, %v77_v14  ;;  %vm95_vm1 = vcmp.lt.s32.totalorder %v76_v16, 1  ;;  %vm98_vm2 = vcmp.lt.s32.totalorder %v76_v16, 4 }
  0x33   :  { %v79_v28 = vshrl.u32 %v287_v18, %v78_v17  ;;  %v81_v29 = vshrl.u32 %v288_v20, %v78_v17  ;;  %v84_v30 = vshrl.u32 %v289_v22, %v78_v17  ;;  %v87_v31 = vshrl.u32 %v290_v24, %v78_v17 }
  0x34   :  { %v90_v32 = vshrl.u32 %v291_v26, %v78_v17  ;;  %v93_v34 = vshrl.u32 %v292_v33, %v78_v17  ;;  %vm96_vm3 = vcmp.lt.s32.totalorder %v76_v16, 2  ;;  %vm97_vm4 = vcmp.lt.s32.totalorder %v76_v16, 3  ;;  %v167_v33 = vld [vmem:[#allocation5] sm:$0xff] }
  0x35   :  { %v82_v36 = vor.u32 %v81_v29, %v80_v19  ;;  %v85_v37 = vor.u32 %v84_v30, %v83_v21  ;;  %v88_v38 = vor.u32 %v87_v31, %v86_v23 }
  0x36   :  { %v91_v39 = vor.u32 %v90_v32, %v89_v25  ;;  %v94_v40 = vor.u32 %v93_v34, %v92_v27  ;;  %v168_v34 = vld [vmem:[#allocation5 + $0x8] sm:$0xff] }
  0x37   :  { %v99_v41 = vsel %vm95_vm1, %v79_v28, %v82_v36  ;;  %v100_v42 = vsel %vm98_vm2, %v88_v38, 2102212464  ;;  %v103_v43 = vsel %vm95_vm1, %v82_v36, %v85_v37  ;;  %v107_v44 = vsel %vm95_vm1, %v85_v37, %v88_v38 }
  0x38   :  { %v101_v45 = vsel %vm97_vm4, %v85_v37, %v100_v42  ;;  %v104_v46 = vsel %vm98_vm2, %v91_v39, 920167782  ;;  %v108_v47 = vsel %vm98_vm2, %v94_v40, 1326507024 }
  0x39   :  { %v105_v48 = vsel %vm97_vm4, %v88_v38, %v104_v46  ;;  %v109_v49 = vsel %vm97_vm4, %v91_v39, %v108_v47  ;;  %v102_v50 = vsel %vm96_vm3, %v99_v41, %v101_v45 }
  0x3a   :  { %v106_v51 = vsel %vm96_vm3, %v103_v43, %v105_v48  ;;  %v110_v52 = vsel %vm96_vm3, %v107_v44, %v109_v49  ;;  %v118_v57 = vmul.u32 %v111_v35, %v102_v50 }
  0x3b   :  { %v332_v53 = vmul.u32.u64.low %v111_v35, %v110_v52  ;;  %v333_v54 = vmul.u32.u64.high %v111_v35, %v110_v52, %v332_v53  ;;  %v335_v55 = vmul.u32.u64.low %v111_v35, %v106_v51  ;;  %v336_v56 = vmul.u32.u64.high %v111_v35, %v106_v51, %v335_v55 }
  0x3d   :  { %vm120_vm5 = vc.u32 %v333_v54, %v335_v55  ;;  %v121_v58 = vadd.s32 1, %v336_v56  ;;  %v119_v5 = vadd.s32 %v335_v55, %v333_v54 }
  0x3f   :  { %v122_v59 = vsel %vm120_vm5, %v121_v58, %v336_v56 }
  0x40   :  { %v123_v60 = vadd.s32 %v122_v59, %v118_v57 }
  0x42   :  { %v124_v61 = vadd.s32 536870912, %v123_v60 }
  0x44   :  { %v125_v62 = vshrl.u32 %v124_v61, 30 }
  0x46   :  { %v126_v63 = vshll.u32 %v125_v62, 30  ;;  %v149_v20 = vsub.s32 4, %v125_v62 }
  0x48   :  { %v127_v0 = vsub.s32 %v123_v60, %v126_v63  ;;  %v150_v23 = vsel %vm65_vm7, %v149_v20, %v125_v62 }
  0x49   :  { %v152_v25 = vsel %vm64_vm8, 0, %v150_v23 }
  0x4a   :  { %v129_v1 = vsub.s32 0, %v127_v0  ;;  %v156_v26 = vadd.s32 3, %v152_v25 }
  0x4c   :  { %v195_v2 = vmin.u32 %v129_v1, %v127_v0  ;;  %v157_v27 = vand.u32 3, %v156_v26 }
  0x4e   :  { %v131_v3 = vclz %v195_v2  ;;  %vm162_vm9 = vcmp.eq.s32.totalorder %v157_v27, 2  ;;  %vm159_vm10 = vcmp.eq.s32.totalorder %v157_v27, 0  ;;  %vm158_vm11 = vcmp.lt.s32.totalorder %v157_v27, 2 }
  0x50   :  { %v196_v4 = vadd.s32 4294967294, %v131_v3 }
  0x52   :  { %vm197_vm6 = vcmp.lt.s32.totalorder %v196_v4, 0 }
  0x53   :  { %v134_v7 = vsel %vm197_vm6, 0, %v196_v4 }
  0x54   :  { %v135_v8 = vsub.s32 32, %v134_v7  ;;  %v136_v10 = vshll.u32 %v127_v0, %v134_v7  ;;  %v139_v11 = vsub.s32 4294967266, %v134_v7 }
  0x56   :  { %v137_v12 = vshrl.u32 %v119_v5, %v135_v8  ;;  %v140_v13 = vadd.s32 127, %v139_v11 }
  0x58   :  { %v138_v14 = vor.u32 %v137_v12, %v136_v10  ;;  %v141_v15 = vshll.u32 %v140_v13, 23 }
  0x5a   :  { %v142_v16 = vor.u32 4788187, %v141_v15  ;;  %v145_v17 = vcvt.s32.f32 %v138_v14 }
  0x5c   :  { %v143_v18 = vand.u32 2147483647, %v142_v16 }
  0x5e   :  { %v146_v19 = vmul.f32 %v145_v17, %v143_v18 }
  0x60   :  { %v147_v21 = vxor.u32 2147483648, %v146_v19 }
  0x62   :  { %v148_v22 = vsel %vm65_vm7, %v147_v21, %v146_v19 }
  0x63   :  { %v151_v24 = vsel %vm64_vm8, %v326_v6, %v148_v22 }
  0x64   :  { %213 = vcosq.f32 %v151_v24 }
  0x65   :  { %215 = vsinq.f32 %v151_v24 }
  0x71   :  { %v214_v28 = vpop.eup %213 }
  0x72   :  { %v216_v29 = vpop.eup %215  ;;  %v163_v30 = vxor.u32 2147483648, %v214_v28 }
  0x73   :  { %v160_v31 = vxor.u32 2147483648, %v216_v29 }
  0x74   :  { %v164_v9 = vsel %vm162_vm9, %v163_v30, %v216_v29 }
  0x75   :  { %v161_v32 = vsel %vm159_vm10, %v214_v28, %v160_v31 }
  0x76   :  { %v165_v35 = vsel %vm158_vm11, %v161_v32, %v164_v9 }
  0x77   :  { %v166_v36 = vsel %vm155_vm12, nan, %v165_v35 }
  0x78   :  { %v169_v37 = vmul.f32 %v167_v33, %v166_v36  ;;  %v170_v38 = vmul.f32 %v168_v34, %v166_v36 }
  0x7a   :  { %172 = vst.msk [vmem:[#allocation7] sm:$0xff] %vm171_vm13, %v169_v37  ;;  %173 = vst.msk [vmem:[#allocation7 + $0x8] sm:$0xff] %vm171_vm13, %v170_v38 }
  0x7b   :  { %268 = shalt.err (!%p265_p0)
}
  0x7c   :  { %185 = dma.vmem_to_hbm [thread:$0]  %s180_s2, 256, %s356_s3, [#allocation4], %s285_s21, %s285_s21, %s286_s22  }
  0x7d   :  { %281 = dma.done.wait [#allocation4], 256  }
  0x7e   :  { %282 = vsyncadd [#allocation4], 4294967040 }
  0x7f   :  { %189 = vsyncpa [#allocation3], 1 }
  0x80   :  { %190 = vsyncpa [#allocation6], 1 }
  0x81   :  { %191 = vsyncpa [#allocation4], 1 }

</bundles_post_ra>
